<compile_context>
chip_gen: v5e
topology: v5e:2x2
jax: 0.10.0
libtpu: 0.0.40
codegen_flags: <defaults>
</compile_context>

<pallas_src>
import math
import functools

import jax
import jax.numpy as jnp
from jax.experimental import pallas as pl
from jax.experimental.pallas import tpu as pltpu


def sine_encoding_kernel(e_ref, sel_ref, div_ref, phase_ref, w0_ref, b_ref,
                         wbd_ref, o_ref):
    # e_ref:     (tm, P)  packed eigenvalues, P logical rows per lane-row
    # sel_ref:   (P, W)   0/1 selector: expands e_p across its H-lane group
    # div_ref:   (1, W)   100 * [div, div] tiled per group
    # phase_ref: (1, W)   [0,...,0, pi/2,...,pi/2] tiled per group
    # w0_ref:    (1, W)   raw-eigenvalue column of W.T, tiled P times
    # b_ref:     (1, W)   bias, tiled P times
    # wbd_ref:   (W, W)   block-diagonal: P copies of [Wsin; Wcos] (H, H)
    # o_ref:     (tm, W)  packed output (row r holds P logical output rows)
    e_exp = jnp.dot(e_ref[...], sel_ref[...],
                    preferred_element_type=jnp.float32)            # (tm, W)
    # One lane-dense sin covers both sin(pe) and cos(pe) (phase shift).
    feats = jnp.sin(e_exp * div_ref[...] + phase_ref[...])         # (tm, W)
    out = jnp.dot(feats, wbd_ref[...], preferred_element_type=jnp.float32)
    out = out + e_exp * w0_ref[...] + b_ref[...]
    o_ref[...] = out.astype(o_ref.dtype)


def _round_up(x, m):
    return ((x + m - 1) // m) * m


@functools.partial(jax.jit, static_argnames=("hidden_dim", "tm"))
def sine_encoding(e, weight, bias, *, hidden_dim=32, tm=2048):
    """e: (B, N) f32; weight: (H, H+1); bias: (H,). Returns (B, N, H)."""
    B, N = e.shape
    H = hidden_dim
    Hh = H // 2
    M = B * N

    # Lane packing: P logical rows per lane-row so tiles are 128-lane dense.
    P = 128 // H if (H <= 128 and 128 % H == 0) else 1
    W = P * H

    # Row-tile selection (in packed rows).
    rows = -(-M // P)                              # ceil(M / P)
    tm_eff = _round_up(min(tm, _round_up(rows, 8)), 8)
    M_rows = _round_up(rows, tm_eff)
    # Keep >= 2 grid steps when there's enough work so v7x's 2 TCs both run.
    if M_rows == tm_eff and tm_eff >= 1024:
        tm_eff //= 2
        M_rows = _round_up(rows, tm_eff)
    grid = (M_rows // tm_eff,)

    # Pack e: (M,) -> (M_rows, P); lane-row r holds logical rows r*P..r*P+P-1.
    e_flat = e.reshape(M).astype(jnp.float32)
    e_pack = jnp.pad(e_flat, (0, M_rows * P - M)).reshape(M_rows, P)

    # div = exp(arange(0, H, 2) * (-ln 1e4 / H)); fold the *100 constant in.
    div = jnp.exp(jnp.arange(0, H, 2, dtype=jnp.float32)
                  * (-math.log(10000.0) / H))                      # (Hh,)
    div2 = 100.0 * jnp.concatenate([div, div])                     # sin | cos halves
    phase = jnp.concatenate([jnp.zeros((Hh,), jnp.float32),
                             jnp.full((Hh,), jnp.pi / 2, jnp.float32)])

    # Split W.T = [w0 (1,H); Wsin (Hh,H); Wcos (Hh,H)].
    w_t = weight.T.astype(jnp.float32)                             # (H+1, H)
    w0 = w_t[0]                                                    # (H,)
    w_sc = w_t[1:]                                                 # (H, H) = [Wsin; Wcos]

    eye_p = jnp.eye(P, dtype=jnp.float32)
    sel = jnp.kron(eye_p, jnp.ones((1, H), jnp.float32))           # (P, W) 0/1
    wbd = jnp.kron(eye_p, w_sc)                                    # (W, W) block-diag
    div_t = jnp.tile(div2, P).reshape(1, W)
    phase_t = jnp.tile(phase, P).reshape(1, W)
    w0_t = jnp.tile(w0, P).reshape(1, W)
    b_t = jnp.tile(bias.astype(jnp.float32), P).reshape(1, W)

    cost = pl.CostEstimate(
        flops=2 * M_rows * (P + W) * W + 4 * M_rows * W,
        transcendentals=M_rows * W,
        bytes_accessed=4 * (M_rows * P + M_rows * W + W * W + P * W + 4 * W),
    )

    out = pl.pallas_call(
        sine_encoding_kernel,
        out_shape=jax.ShapeDtypeStruct((M_rows, W), jnp.float32),
        grid_spec=pltpu.PrefetchScalarGridSpec(
            num_scalar_prefetch=0,
            grid=grid,
            in_specs=[
                pl.BlockSpec((tm_eff, P), lambda i: (i, 0)),   # packed e rows
                pl.BlockSpec((P, W), lambda i: (0, 0)),        # selector
                pl.BlockSpec((1, W), lambda i: (0, 0)),        # 100*div (tiled)
                pl.BlockSpec((1, W), lambda i: (0, 0)),        # phase (tiled)
                pl.BlockSpec((1, W), lambda i: (0, 0)),        # w0 (tiled)
                pl.BlockSpec((1, W), lambda i: (0, 0)),        # bias (tiled)
                pl.BlockSpec((W, W), lambda i: (0, 0)),        # block-diag [Wsin;Wcos]
            ],
            out_specs=pl.BlockSpec((tm_eff, W), lambda i: (i, 0)),
        ),
        compiler_params=pltpu.CompilerParams(
            dimension_semantics=("parallel",)),
        cost_estimate=cost,
    )(e_pack, sel, div_t, phase_t, w0_t, b_t, wbd)

    # (M_rows, P*H) is a byte-identical view of (M_rows*P, H).
    return out.reshape(M_rows * P, H)[:M].reshape(B, N, H)


def sine_encoding_ref(e, weight, bias, hidden_dim):
    """Pure-JAX reference mirroring the PyTorch forward exactly."""
    H = hidden_dim
    ee = e * 100.0
    div = jnp.exp(jnp.arange(0, H, 2, dtype=jnp.float32)
                  * (-math.log(10000.0) / H))
    pe = ee[..., None] * div                                       # (B, N, H/2)
    eeig = jnp.concatenate([e[..., None], jnp.sin(pe), jnp.cos(pe)], axis=2)
    return eeig @ weight.T + bias


if __name__ == "__main__":
    B, N = 2, 64            # 2 graphs x 64 eigenvalues -> 128 logical rows
    HIDDEN = 32             # hidden_dim

    key = jax.random.PRNGKey(0)
    k_e, k_w, k_b = jax.random.split(key, 3)

    # Eigenvalue-like inputs in [0, 2].
    e = jax.random.uniform(k_e, (B, N), dtype=jnp.float32, minval=0.0, maxval=2.0)

    # Deterministic Linear(hidden+1 -> hidden) params (PyTorch-default-style uniform).
    fan_in = HIDDEN + 1
    bound = 1.0 / math.sqrt(fan_in)
    weight = jax.random.uniform(k_w, (HIDDEN, HIDDEN + 1), dtype=jnp.float32,
                                minval=-bound, maxval=bound)
    bias = jax.random.uniform(k_b, (HIDDEN,), dtype=jnp.float32,
                              minval=-bound, maxval=bound)

    out = sine_encoding(e, weight, bias, hidden_dim=HIDDEN)
    out = jax.block_until_ready(out)

    ref = sine_encoding_ref(e, weight, bias, HIDDEN)
    assert out.shape == (B, N, HIDDEN)
    err = float(jnp.max(jnp.abs(out - ref)))
    assert jnp.allclose(out, ref, atol=2e-4, rtol=2e-4), err

    print("KERNEL_OK")
</pallas_src>

<mosaic_0001>
module attributes {stable_mosaic.version = 11 : i64} {
  func.func @sine_encoding_kernel(%arg0: i32, %arg1: memref<32x4xf32, #tpu.memory_space<vmem>>, %arg2: memref<4x128xf32, #tpu.memory_space<vmem>>, %arg3: memref<1x128xf32, #tpu.memory_space<vmem>>, %arg4: memref<1x128xf32, #tpu.memory_space<vmem>>, %arg5: memref<1x128xf32, #tpu.memory_space<vmem>>, %arg6: memref<1x128xf32, #tpu.memory_space<vmem>>, %arg7: memref<128x128xf32, #tpu.memory_space<vmem>>, %arg8: memref<32x128xf32, #tpu.memory_space<vmem>>) attributes {dimension_semantics = [#tpu.dimension_semantics<parallel>], iteration_bounds = array<i64: 1>, scalar_prefetch = 0 : i64, scratch_operands = 0 : i64, tpu.core_type = #tpu.core_type<tc>, window_params = [{transform_indices = @transform_0, window_bounds = array<i64: 32, 4>}, {pipeline_mode = #tpu.pipeline_mode<synchronous>, transform_indices = @transform_1, window_bounds = array<i64: 4, 128>}, {pipeline_mode = #tpu.pipeline_mode<synchronous>, transform_indices = @transform_2, window_bounds = array<i64: 1, 128>}, {pipeline_mode = #tpu.pipeline_mode<synchronous>, transform_indices = @transform_3, window_bounds = array<i64: 1, 128>}, {pipeline_mode = #tpu.pipeline_mode<synchronous>, transform_indices = @transform_4, window_bounds = array<i64: 1, 128>}, {pipeline_mode = #tpu.pipeline_mode<synchronous>, transform_indices = @transform_5, window_bounds = array<i64: 1, 128>}, {pipeline_mode = #tpu.pipeline_mode<synchronous>, transform_indices = @transform_6, window_bounds = array<i64: 128, 128>}, {transform_indices = @transform_7, window_bounds = array<i64: 32, 128>}]} {
    %c0 = arith.constant 0 : index
    %c0_0 = arith.constant 0 : index
    %0 = vector.load %arg1[%c0, %c0_0] : memref<32x4xf32, #tpu.memory_space<vmem>>, vector<32x4xf32>
    %c0_1 = arith.constant 0 : index
    %c0_2 = arith.constant 0 : index
    %1 = vector.load %arg2[%c0_1, %c0_2] : memref<4x128xf32, #tpu.memory_space<vmem>>, vector<4x128xf32>
    %cst = arith.constant dense<0.000000e+00> : vector<32x128xf32>
    %2 = tpu.matmul %0, %1, %cst {dimension_numbers = #tpu.dot_dimension_numbers<[1], [0], [0], [1], [0, 0, 1, 1], [], []>} : vector<32x4xf32>, vector<4x128xf32>, vector<32x128xf32> -> vector<32x128xf32>
    %c0_3 = arith.constant 0 : index
    %c0_4 = arith.constant 0 : index
    %3 = vector.load %arg3[%c0_3, %c0_4] : memref<1x128xf32, #tpu.memory_space<vmem>>, vector<1x128xf32>
    %4 = vector.broadcast %3 : vector<1x128xf32> to vector<32x128xf32>
    %5 = arith.mulf %2, %4 : vector<32x128xf32>
    %c0_5 = arith.constant 0 : index
    %c0_6 = arith.constant 0 : index
    %6 = vector.load %arg4[%c0_5, %c0_6] : memref<1x128xf32, #tpu.memory_space<vmem>>, vector<1x128xf32>
    %7 = vector.broadcast %6 : vector<1x128xf32> to vector<32x128xf32>
    %8 = arith.addf %5, %7 : vector<32x128xf32>
    %9 = math.sin %8 : vector<32x128xf32>
    %c0_7 = arith.constant 0 : index
    %c0_8 = arith.constant 0 : index
    %10 = vector.load %arg7[%c0_7, %c0_8] : memref<128x128xf32, #tpu.memory_space<vmem>>, vector<128x128xf32>
    %cst_9 = arith.constant dense<0.000000e+00> : vector<32x128xf32>
    %11 = tpu.matmul %9, %10, %cst_9 {dimension_numbers = #tpu.dot_dimension_numbers<[1], [0], [0], [1], [0, 0, 1, 1], [], []>} : vector<32x128xf32>, vector<128x128xf32>, vector<32x128xf32> -> vector<32x128xf32>
    %c0_10 = arith.constant 0 : index
    %c0_11 = arith.constant 0 : index
    %12 = vector.load %arg5[%c0_10, %c0_11] : memref<1x128xf32, #tpu.memory_space<vmem>>, vector<1x128xf32>
    %13 = vector.broadcast %12 : vector<1x128xf32> to vector<32x128xf32>
    %14 = arith.mulf %2, %13 : vector<32x128xf32>
    %15 = arith.addf %11, %14 : vector<32x128xf32>
    %c0_12 = arith.constant 0 : index
    %c0_13 = arith.constant 0 : index
    %16 = vector.load %arg6[%c0_12, %c0_13] : memref<1x128xf32, #tpu.memory_space<vmem>>, vector<1x128xf32>
    %17 = vector.broadcast %16 : vector<1x128xf32> to vector<32x128xf32>
    %18 = arith.addf %15, %17 : vector<32x128xf32>
    %c0_14 = arith.constant 0 : index
    %c0_15 = arith.constant 0 : index
    %19 = vector.load %arg8[%c0_14, %c0_15] : memref<32x128xf32, #tpu.memory_space<vmem>>, vector<32x128xf32>
    tpu.vector_store %arg8[%c0_14, %c0_15], %18 {strides = array<i32>} : memref<32x128xf32, #tpu.memory_space<vmem>>, vector<32x128xf32>,
    return
  }
  func.func @transform_0(%arg0: i32) -> (i32, i32) {
    %c0_i32 = arith.constant 0 : i32
    %c0_i32_0 = arith.constant 0 : i32
    return %arg0, %c0_i32 : i32, i32
  }
  func.func @transform_1(%arg0: i32) -> (i32, i32) {
    %c0_i32 = arith.constant 0 : i32
    %c0_i32_0 = arith.constant 0 : i32
    %c0_i32_1 = arith.constant 0 : i32
    return %c0_i32, %c0_i32_0 : i32, i32
  }
  func.func @transform_2(%arg0: i32) -> (i32, i32) {
    %c0_i32 = arith.constant 0 : i32
    %c0_i32_0 = arith.constant 0 : i32
    %c0_i32_1 = arith.constant 0 : i32
    return %c0_i32, %c0_i32_0 : i32, i32
  }
  func.func @transform_3(%arg0: i32) -> (i32, i32) {
    %c0_i32 = arith.constant 0 : i32
    %c0_i32_0 = arith.constant 0 : i32
    %c0_i32_1 = arith.constant 0 : i32
    return %c0_i32, %c0_i32_0 : i32, i32
  }
  func.func @transform_4(%arg0: i32) -> (i32, i32) {
    %c0_i32 = arith.constant 0 : i32
    %c0_i32_0 = arith.constant 0 : i32
    %c0_i32_1 = arith.constant 0 : i32
    return %c0_i32, %c0_i32_0 : i32, i32
  }
  func.func @transform_5(%arg0: i32) -> (i32, i32) {
    %c0_i32 = arith.constant 0 : i32
    %c0_i32_0 = arith.constant 0 : i32
    %c0_i32_1 = arith.constant 0 : i32
    return %c0_i32, %c0_i32_0 : i32, i32
  }
  func.func @transform_6(%arg0: i32) -> (i32, i32) {
    %c0_i32 = arith.constant 0 : i32
    %c0_i32_0 = arith.constant 0 : i32
    %c0_i32_1 = arith.constant 0 : i32
    return %c0_i32, %c0_i32_0 : i32, i32
  }
  func.func @transform_7(%arg0: i32) -> (i32, i32) {
    %c0_i32 = arith.constant 0 : i32
    %c0_i32_0 = arith.constant 0 : i32
    return %arg0, %c0_i32 : i32, i32
  }
}

</mosaic_0001>

<bundles_post_ra>
// kernel: tile.29
= control target key start
LH: loop header
LB: loop body
LE: loop exit
PB: predicated region body
PF: predicated region fallthrough
CT: control target
= control target key end

     0   :  { %s22_s0 = inlined_call_operand.vmem [shape: f32[32], index: 0, kind: input, shape index: {}]   ;;  %s23_s1 = inlined_call_operand.vmem [shape: f32[4,32], index: 1, kind: output, shape index: {}]  }
   0x1   :  { %v4_v0 = vld [vmem:[%s22_s0] ss:$0 sm:$0xff] }
   0x2   :  { %5 = vst [vmem:[%s23_s1] sm:$0xf] %v4_v0 }

// kernel: tile.30
= control target key start
LH: loop header
LB: loop body
LE: loop exit
PB: predicated region body
PF: predicated region fallthrough
CT: control target
= control target key end

     0   :  { %s37_s8 = smov 32   ;;  %s38_s9 = smov 64   ;;  %vm7_vm0 = vcmask 261120   ;;  %vm13_vm1 = vcmask 1048320   ;;  %vm19_vm2 = vcmask 785920   ;;  %vm25_vm3 = vcmask 523520   ;;  %s55_s0 = inlined_call_operand.vmem [shape: f32[4,32], index: 0, kind: input, shape index: {}]   ;;  %s56_s1 = inlined_call_operand.vmem [shape: f32[1,128], index: 1, kind: output, shape index: {}]  }
   0x1   :  { %v4_v0 = vld [vmem:[%s55_s0] sm:$0xf]  ;;  %s36_s0 = smov 96  }
   0x2   :  { %5 = vst [vmem:[#allocation1] sm:$0xf] %v4_v0 }
   0x9   :  { %v10_v1 = vld [vmem:[#allocation1 + $0x3] sm:$0x1]   ;;  %v22_v2 = vld [vmem:[#allocation1 + $0x1] sm:$0x1]   ;;  %v16_v3 = vld [vmem:[#allocation1 + $0x2] sm:$0x1]  }
   0xa   :  { %11 = vrot.lane.b32.xlu0 %v10_v1, %s36_s0  ;;  %23 = vrot.lane.b32.xlu1 %v22_v2, %s37_s8  ;;  %v6_v4 = vld [vmem:[#allocation1] sm:$0x1]  }
   0xb   :  { %8 = vst.msk [vmem:[#allocation0] sm:$0x1] %vm7_vm0, %v6_v4  }
  0x12   :  { %17 = vrot.lane.b32.xlu0 %v16_v3, %s38_s9 }
  0x7c   :  { %v12_v5 = vpop.permute.xlu0 %11   ;;  %v24_v6 = vpop.permute.xlu1 %23  }
  0x7d   :  { %14 = vst.msk [vmem:[#allocation0] sm:$0x1] %vm13_vm1, %v12_v5  }
  0x84   :  { %v18_v7 = vpop.permute.xlu0 %17  }
  0x85   :  { %20 = vst.msk [vmem:[#allocation0] sm:$0x1] %vm19_vm2, %v18_v7  }
  0x86   :  { %26 = vst.msk [vmem:[#allocation0] sm:$0x1] %vm25_vm3, %v24_v6  }
  0x8d   :  { %v29_v8 = vld [vmem:[#allocation0] sm:$0x1] }
  0x8e   :  { %32 = vst [vmem:[%s56_s1] sm:$0x1] %v29_v8 }

// kernel: sine_encoding.1
= control target key start
LH: loop header
LB: loop body
LE: loop exit
PB: predicated region body
PF: predicated region fallthrough
CT: control target
= control target key end

     0   :  { %vm44_vm0 = vcmask 1043456   ;;  %vm31_vm1 = vcmask 31744   ;;  %v859_v35 = vmov 683565275   ;;  %v860_v40 = vmov 2475754826   ;;  %s1497_s1 = inlined_call_operand.vmem [shape: f32[4,128], index: 1, kind: input, shape index: {}]   ;;  %s1498_s0 = inlined_call_operand.vmem [shape: f32[32,4], index: 0, kind: input, shape index: {}]   ;;  %s1499_s2 = inlined_call_operand.vmem [shape: f32[1,128], index: 2, kind: input, shape index: {}]   ;;  %s1500_s3 = inlined_call_operand.vmem [shape: f32[1,128], index: 3, kind: input, shape index: {}]   ;;  %s1501_s4 = inlined_call_operand.vmem [shape: f32[1,128], index: 4, kind: input, shape index: {}]   ;;  %s1502_s6 = inlined_call_operand.vmem [shape: f32[128,128], index: 6, kind: input, shape index: {}]   ;;  %s1503_s5 = inlined_call_operand.vmem [shape: f32[1,128], index: 5, kind: input, shape index: {}]   ;;  %s1504_s7 = inlined_call_operand.vmem [shape: f32[32,128], index: 7, kind: output, shape index: {}]  }
   0x1   :  { %v30_v0 = vld [vmem:[%s1497_s1] sm:$0xf]  ;;  %v27_v2 = vld [vmem:[%s1498_s0 + $0x8] sm:$0xff]  ;;  %v28_v3 = vld [vmem:[%s1498_s0 + $0x10] sm:$0xff]  ;;  %v861_v44 = vmov 2131351028  }
   0x2   :  { %v26_v1 = vld [vmem:[%s1498_s0] sm:$0xff]  ;;  %782 = vmatpush.msk.msra.mxu0 %vm44_vm0, %v30_v0  ;;  %v29_v4 = vld [vmem:[%s1498_s0 + $0x18] sm:$0xff]  ;;  %v727_v16 = vld [vmem:[%s1502_s6 + $0x70] sm:$0xff]  ;;  %v862_v47 = vmov 2102212464  }
   0x3   :  { %783 = vmatmul.msk.f32.vlgmr.msra.gmra.mxu0 %vm31_vm1, %v26_v1  ;;  %v924_v5 = vld [vmem:[%s1499_s2] ss:$0 sm:$0xff]  ;;  %v728_v15 = vld [vmem:[%s1502_s6 + $0x78] sm:$0xff]  ;;  %v726_v19 = vld [vmem:[%s1502_s6 + $0x68] sm:$0xff]  ;;  %v863_v53 = vmov 920167782  }
   0x4   :  { %v929_v6 = vld [vmem:[%s1500_s3] ss:$0 sm:$0xff]  ;;  %737 = vmatpush.msrb.mxu0 %v728_v15  ;;  %799 = vmatpush.msra.mxu1 %v728_v15  ;;  %v724_v27 = vld [vmem:[%s1502_s6 + $0x58] sm:$0xff]  ;;  %v723_v34 = vld [vmem:[%s1502_s6 + $0x50] sm:$0xff]  ;;  %v864_v63 = vmov 1326507024  }
   0x5   :  { %800 = vmatpush.msra.mxu2 %v728_v15  ;;  %801 = vmatpush.msra.mxu3 %v728_v15  ;;  %v725_v22 = vld [vmem:[%s1502_s6 + $0x60] sm:$0xff]  ;;  %v722_v38 = vld [vmem:[%s1502_s6 + $0x48] sm:$0xff]  ;;  %v720_v58 = vld [vmem:[%s1502_s6 + $0x38] sm:$0xff] }
   0x6   :  { %738 = vmatpush.msrb.mxu0 %v727_v16  ;;  %802 = vmatpush.msra.mxu1 %v727_v16  ;;  %v856_v24 = vld [vmem:[%s1501_s4] ss:$0 sm:$0xff] }
   0x7   :  { %803 = vmatpush.msra.mxu2 %v727_v16  ;;  %804 = vmatpush.msra.mxu3 %v727_v16  ;;  %v721_v51 = vld [vmem:[%s1502_s6 + $0x40] sm:$0xff] }
   0x8   :  { %739 = vmatpush.msrb.mxu0 %v726_v19  ;;  %805 = vmatpush.msra.mxu1 %v726_v19 }
   0x9   :  { %806 = vmatpush.msra.mxu2 %v726_v19  ;;  %807 = vmatpush.msra.mxu3 %v726_v19  ;;  %v717_v19 = vld [vmem:[%s1502_s6 + $0x20] sm:$0xff] }
   0xa   :  { %740 = vmatpush.msrb.mxu0 %v725_v22  ;;  %808 = vmatpush.msra.mxu1 %v725_v22 }
   0xb   :  { %784 = vmatmul.msk.f32.gmra.mxu0 %vm31_vm1, %v27_v2  ;;  %809 = vmatpush.msra.mxu2 %v725_v22 }
   0xc   :  { %810 = vmatpush.msra.mxu3 %v725_v22  ;;  %741 = vmatpush.msrb.mxu0 %v724_v27 }
   0xd   :  { %811 = vmatpush.msra.mxu1 %v724_v27  ;;  %812 = vmatpush.msra.mxu2 %v724_v27 }
   0xe   :  { %813 = vmatpush.msra.mxu3 %v724_v27  ;;  %742 = vmatpush.msrb.mxu0 %v723_v34 }
   0xf   :  { %814 = vmatpush.msra.mxu1 %v723_v34  ;;  %815 = vmatpush.msra.mxu2 %v723_v34 }
  0x10   :  { %816 = vmatpush.msra.mxu3 %v723_v34  ;;  %743 = vmatpush.msrb.mxu0 %v722_v38 }
  0x11   :  { %817 = vmatpush.msra.mxu1 %v722_v38  ;;  %818 = vmatpush.msra.mxu2 %v722_v38 }
  0x12   :  { %819 = vmatpush.msra.mxu3 %v722_v38  ;;  %744 = vmatpush.msrb.mxu0 %v721_v51 }
  0x13   :  { %785 = vmatmul.msk.f32.gmra.mxu0 %vm31_vm1, %v28_v3  ;;  %820 = vmatpush.msra.mxu1 %v721_v51  ;;  %v719_v3 = vld [vmem:[%s1502_s6 + $0x30] sm:$0xff] }
  0x14   :  { %821 = vmatpush.msra.mxu2 %v721_v51  ;;  %822 = vmatpush.msra.mxu3 %v721_v51 }
  0x15   :  { %745 = vmatpush.msrb.mxu0 %v720_v58  ;;  %823 = vmatpush.msra.mxu1 %v720_v58 }
  0x16   :  { %824 = vmatpush.msra.mxu2 %v720_v58  ;;  %825 = vmatpush.msra.mxu3 %v720_v58 }
  0x17   :  { %746 = vmatpush.msrb.mxu0 %v719_v3  ;;  %826 = vmatpush.msra.mxu1 %v719_v3 }
  0x18   :  { %827 = vmatpush.msra.mxu2 %v719_v3  ;;  %828 = vmatpush.msra.mxu3 %v719_v3 }
  0x1b   :  { %786 = vmatmul.msk.f32.gmra.mxu0 %vm31_vm1, %v29_v4 }
  0x80   :  { %v931_v7 = vpop.f32.mrf.mxu0 }
  0x81   :  { %v81_v8 = vmul.f32 %v924_v5, %v931_v7 }
  0x83   :  { %v936_v9 = vadd.f32 %v929_v6, %v81_v8 }
  0x85   :  { %v96_v10 = vand.u32 2139095040, %v936_v9  ;;  %v93_v20 = vand.u32 2147483647, %v936_v9 }
  0x87   :  { %v97_v11 = vshrl.u32 %v96_v10, 23  ;;  %v100_v28 = vand.u32 8388607, %v93_v20 }
  0x88   :  { %v939_v12 = vpop.f32.mrf.mxu0 }
  0x89   :  { %v787_v13 = vadd.s32 4294967169, %v97_v11  ;;  %v82_v14 = vmul.f32 %v924_v5, %v939_v12  ;;  %v101_v39 = vor.u32 8388608, %v100_v28 }
  0x8b   :  { %v103_v17 = vadd.s32 1, %v787_v13  ;;  %v950_v18 = vadd.f32 %v929_v6, %v82_v14  ;;  %v1012_v1 = vshll.u32 %v101_v39, 8  ;;  %v718_v13 = vld [vmem:[%s1502_s6 + $0x28] sm:$0xff] }
  0x8c   :  { %747 = vmatpush.msrb.mxu0 %v718_v13  ;;  %829 = vmatpush.msra.mxu1 %v718_v13 }
  0x8d   :  { %vm104_vm2 = vcmp.gt.s32.totalorder %v103_v17, 0  ;;  %v251_v21 = vand.u32 2139095040, %v950_v18  ;;  %v143_v34 = vshrl.u32 %v1012_v1, 16  ;;  %830 = vmatpush.msra.mxu2 %v718_v13  ;;  %831 = vmatpush.msra.mxu3 %v718_v13 }
  0x8e   :  { %v105_v23 = vsel %vm104_vm2, %v103_v17, 0  ;;  %748 = vmatpush.msrb.mxu0 %v717_v19  ;;  %832 = vmatpush.msra.mxu1 %v717_v19  ;;  %vm95_vm2 = vcmp.lt.s32.totalorder %v936_v9, 0 }
  0x8f   :  { %v107_v25 = vand.u32 31, %v105_v23  ;;  %v252_v26 = vshrl.u32 %v251_v21, 23  ;;  %v986_v43 = vshrl.u32 %v105_v23, 5  ;;  %v142_v23 = vand.u32 65535, %v1012_v1  ;;  %833 = vmatpush.msra.mxu2 %v717_v19  ;;  %834 = vmatpush.msra.mxu3 %v717_v19 }
  0x90   :  { %v71_v29 = vpop.f32.mrf.mxu0 }
  0x91   :  { %v968_v30 = vsub.s32 32, %v107_v25  ;;  %v790_v31 = vadd.s32 4294967169, %v252_v26  ;;  %v83_v32 = vmul.f32 %v924_v5, %v71_v29  ;;  %v971_v33 = vmul.f32 %v856_v24, %v71_v29 }
  0x92   :  { %v110_v36 = vshll.u32 %v859_v35, %v107_v25  ;;  %v113_v42 = vshll.u32 %v860_v40, %v107_v25  ;;  %v116_v46 = vshll.u32 %v861_v44, %v107_v25  ;;  %v119_v52 = vshll.u32 %v862_v47, %v107_v25 }
  0x93   :  { %v978_v37 = vadd.f32 %v929_v6, %v83_v32  ;;  %v111_v41 = vshrl.u32 %v860_v40, %v968_v30  ;;  %v114_v45 = vshrl.u32 %v861_v44, %v968_v30  ;;  %v117_v48 = vshrl.u32 %v862_v47, %v968_v30  ;;  %v716_v32 = vld [vmem:[%s1502_s6 + $0x18] sm:$0xff] }
  0x94   :  { %v258_v49 = vadd.s32 1, %v790_v31  ;;  %v120_v54 = vshrl.u32 %v863_v53, %v968_v30  ;;  %v122_v62 = vshll.u32 %v863_v53, %v107_v25  ;;  %v123_v0 = vshrl.u32 %v864_v63, %v968_v30  ;;  %749 = vmatpush.msrb.mxu0 %v716_v32  ;;  %835 = vmatpush.msra.mxu1 %v716_v32 }
  0x95   :  { %v406_v50 = vand.u32 2139095040, %v978_v37  ;;  %v1000_v55 = vor.u32 %v111_v41, %v110_v36  ;;  %v1002_v56 = vor.u32 %v114_v45, %v113_v42  ;;  %v118_v59 = vor.u32 %v117_v48, %v116_v46  ;;  %v715_v42 = vld [vmem:[%s1502_s6 + $0x10] sm:$0xff]  ;;  %836 = vmatpush.msra.mxu2 %v716_v32  ;;  %837 = vmatpush.msra.mxu3 %v716_v32 }
  0x96   :  { %v121_v60 = vor.u32 %v120_v54, %v119_v52  ;;  %vm259_vm3 = vcmp.gt.s32.totalorder %v258_v49, 0  ;;  %vm125_vm4 = vcmp.lt.s32.totalorder %v986_v43, 1  ;;  %vm128_vm5 = vcmp.lt.s32.totalorder %v986_v43, 4  ;;  %v714_v54 = vld [vmem:[%s1502_s6 + $0x8] sm:$0xff]  ;;  %750 = vmatpush.msrb.mxu0 %v715_v42  ;;  %838 = vmatpush.msra.mxu1 %v715_v42 }
  0x97   :  { %v407_v57 = vshrl.u32 %v406_v50, 23  ;;  %v124_v4 = vor.u32 %v123_v0, %v122_v62  ;;  %vm127_vm6 = vcmp.lt.s32.totalorder %v986_v43, 3  ;;  %vm126_vm7 = vcmp.lt.s32.totalorder %v986_v43, 2  ;;  %v713_v62 = vld [vmem:[%s1502_s6] sm:$0xff]  ;;  %839 = vmatpush.msra.mxu2 %v715_v42  ;;  %840 = vmatpush.msra.mxu3 %v715_v42 }
  0x98   :  { %v1007_v61 = vpop.f32.mrf.mxu0  ;;  %v134_v8 = vsel %vm128_vm5, %v121_v60, 920167782  ;;  %v260_v15 = vsel %vm259_vm3, %v258_v49, 0  ;;  %v130_v21 = vsel %vm128_vm5, %v118_v59, 2102212464  ;;  %v109_v25 = vshrl.u32 %v859_v35, %v968_v30  ;;  %751 = vmatpush.msrb.mxu0 %v714_v54  ;;  %841 = vmatpush.msra.mxu1 %v714_v54 }
  0x99   :  { %v84_v2 = vmul.f32 %v924_v5, %v1007_v61  ;;  %v133_v5 = vsel %vm125_vm4, %v1000_v55, %v1002_v56  ;;  %v793_v10 = vadd.s32 4294967169, %v407_v57  ;;  %v135_v14 = vsel %vm127_vm6, %v118_v59, %v134_v8  ;;  %842 = vmatpush.msra.mxu2 %v714_v54  ;;  %843 = vmatpush.msra.mxu3 %v714_v54 }
  0x9a   :  { %v136_v16 = vsel %vm126_vm7, %v133_v5, %v135_v14  ;;  %v138_v17 = vsel %vm128_vm5, %v124_v4, 1326507024  ;;  %v248_v24 = vand.u32 2147483647, %v950_v18  ;;  %v1058_v29 = vand.u32 31, %v260_v15  ;;  %752 = vmatpush.msrb.mxu0 %v713_v62  ;;  %844 = vmatpush.msra.mxu1 %v713_v62 }
  0x9b   :  { %v1029_v11 = vadd.f32 %v929_v6, %v84_v2  ;;  %v137_v6 = vsel %vm125_vm4, %v1002_v56, %v118_v59  ;;  %v139_v22 = vsel %vm127_vm6, %v121_v60, %v138_v17  ;;  %v166_v27 = vand.u32 65535, %v136_v16  ;;  %845 = vmatpush.msra.mxu2 %v713_v62  ;;  %846 = vmatpush.msra.mxu3 %v713_v62 }
  0x9c   :  { %v140_v26 = vsel %vm126_vm7, %v137_v6, %v139_v22  ;;  %v167_v28 = vshrl.u32 %v136_v16, 16  ;;  %v413_v31 = vadd.s32 1, %v793_v10  ;;  %v129_v30 = vsel %vm125_vm4, %v109_v25, %v1000_v55 }
  0x9d   :  { %v144_v36 = vand.u32 65535, %v140_v26  ;;  %v131_v38 = vsel %vm127_vm6, %v1002_v56, %v130_v21  ;;  %v145_v39 = vshrl.u32 %v140_v26, 16  ;;  %v1079_v46 = vand.u32 8388607, %v248_v24 }
  0x9e   :  { %v1070_v41 = vmul.u32 %v167_v28, %v142_v23  ;;  %v1081_v48 = vshrl.u32 %v260_v15, 5  ;;  %v1083_v50 = vmul.u32 %v166_v27, %v143_v34  ;;  %v1087_v52 = vsub.s32 32, %v1058_v29 }
  0x9f   :  { %v1075_v45 = vmul.u32 %v144_v36, %v143_v34  ;;  %v147_v49 = vmul.u32 %v145_v39, %v142_v23  ;;  %vm414_vm8 = vcmp.gt.s32.totalorder %v413_v31, 0  ;;  %v1094_v55 = vsel %vm126_vm7, %v129_v30, %v131_v38 }
  0xa0   :  { %v172_v51 = vshll.u32 %v1070_v41, 16  ;;  %v168_v56 = vmul.u32 %v166_v27, %v142_v23  ;;  %v561_v57 = vand.u32 2139095040, %v1029_v11  ;;  %v146_v58 = vmul.u32 %v144_v36, %v142_v23 }
  0xa1   :  { %v149_v59 = vmul.u32 %v145_v39, %v143_v34  ;;  %v150_v60 = vshll.u32 %v147_v49, 16  ;;  %v152_v0 = vshll.u32 %v1075_v45, 16  ;;  %v171_v2 = vmul.u32 %v167_v28, %v143_v34 }
  0xa2   :  { %vm176_vm9 = vc.u32 %v168_v56, %v172_v51  ;;  %v178_v43 = vadd.s32 %v172_v51, %v168_v56  ;;  %v174_v4 = vshll.u32 %v1083_v50, 16  ;;  %v865_v5 = vmov 0  }
  0xa3   :  { %vm154_vm10 = vc.u32 %v146_v58, %v150_v60  ;;  %v156_v3 = vadd.s32 %v150_v60, %v146_v58  ;;  %v177_v8 = vsel %vm176_vm9, 1, %v865_v5  ;;  %v1104_v10 = vsel %vm414_vm8, %v413_v31, 0 }
  0xa4   :  { %v153_v13 = vshrl.u32 %v1075_v45, 16  ;;  %v155_v14 = vsel %vm154_vm10, 1, %v865_v5  ;;  %v179_v15 = vadd.s32 %v177_v8, %v171_v2  ;;  %v173_v6 = vshrl.u32 %v1070_v41, 16 }
  0xa5   :  { %v157_v16 = vadd.s32 %v155_v14, %v149_v59  ;;  %vm158_vm11 = vc.u32 %v156_v3, %v152_v0  ;;  %vm180_vm12 = vc.u32 %v178_v43, %v174_v4  ;;  %v151_v17 = vshrl.u32 %v147_v49, 16 }
  0xa6   :  { %v159_v19 = vsel %vm158_vm11, 1, %v865_v5  ;;  %v175_v21 = vshrl.u32 %v1083_v50, 16  ;;  %v181_v22 = vsel %vm180_vm12, 1, %v865_v5  ;;  %v265_v26 = vshll.u32 %v859_v35, %v1058_v29 }
  0xa7   :  { %v161_v23 = vadd.s32 %v159_v19, %v157_v16  ;;  %v183_v25 = vadd.s32 %v181_v22, %v179_v15  ;;  %v266_v27 = vshrl.u32 %v860_v40, %v1087_v52  ;;  %v268_v28 = vshll.u32 %v860_v40, %v1058_v29 }
  0xa8   :  { %v269_v31 = vshrl.u32 %v861_v44, %v1087_v52  ;;  %v271_v32 = vshll.u32 %v861_v44, %v1058_v29  ;;  %v272_v34 = vshrl.u32 %v862_v47, %v1087_v52  ;;  %v1124_v30 = vadd.s32 %v178_v43, %v174_v4 }
  0xa9   :  { %v162_v36 = vadd.s32 %v161_v23, %v151_v17  ;;  %v184_v38 = vadd.s32 %v183_v25, %v173_v6  ;;  %v267_v39 = vor.u32 %v266_v27, %v265_v26  ;;  %v274_v45 = vshll.u32 %v862_v47, %v1058_v29 }
  0xaa   :  { %v270_v41 = vor.u32 %v269_v31, %v268_v28  ;;  %v273_v42 = vor.u32 %v272_v34, %v271_v32  ;;  %v275_v49 = vshrl.u32 %v863_v53, %v1087_v52  ;;  %v277_v54 = vshll.u32 %v863_v53, %v1058_v29 }
  0xab   :  { %v1130_v50 = vadd.s32 %v162_v36, %v153_v13  ;;  %v185_v51 = vadd.s32 %v184_v38, %v175_v21  ;;  %v278_v56 = vshrl.u32 %v864_v63, %v1087_v52  ;;  %v562_v58 = vshrl.u32 %v561_v57, 23 }
  0xac   :  { %v256_v59 = vor.u32 8388608, %v1079_v46  ;;  %v276_v60 = vor.u32 %v275_v49, %v274_v45  ;;  %vm280_vm13 = vcmp.lt.s32.totalorder %v1081_v48, 1  ;;  %vm283_vm15 = vcmp.lt.s32.totalorder %v1081_v48, 4 }
  0xad   :  { %vm188_vm14 = vc.u32 %v1130_v50, %v1124_v30  ;;  %v189_v62 = vadd.s32 1, %v185_v51  ;;  %v279_v0 = vor.u32 %v278_v56, %v277_v54  ;;  %v186_v2 = vmul.u32 %v1012_v1, %v1094_v55 }
  0xae   :  { %vm282_vm0 = vcmp.lt.s32.totalorder %v1081_v48, 3  ;;  %v288_v29 = vsel %vm280_vm13, %v267_v39, %v270_v41  ;;  %v289_v46 = vsel %vm283_vm15, %v276_v60, 920167782  ;;  %vm281_vm1 = vcmp.lt.s32.totalorder %v1081_v48, 2 }
  0xaf   :  { %v190_v57 = vsel %vm188_vm14, %v189_v62, %v185_v51  ;;  %v290_v43 = vsel %vm282_vm0, %v273_v42, %v289_v46  ;;  %v292_v3 = vsel %vm280_vm13, %v270_v41, %v273_v42  ;;  %v1154_v4 = vand.u32 31, %v1104_v10 }
  0xb0   :  { %v191_v1 = vadd.s32 %v190_v57, %v186_v2  ;;  %v291_v55 = vsel %vm281_vm1, %v288_v29, %v290_v43  ;;  %v293_v8 = vsel %vm283_vm15, %v279_v0, 1326507024  ;;  %v796_v13 = vadd.s32 4294967169, %v562_v58 }
  0xb1   :  { %v264_v14 = vshrl.u32 %v859_v35, %v1087_v52  ;;  %v294_v15 = vsel %vm282_vm0, %v276_v60, %v293_v8  ;;  %v1164_v16 = vshll.u32 %v256_v59, 8  ;;  %v285_v17 = vsel %vm283_vm15, %v273_v42, 2102212464 }
  0xb2   :  { %v192_v6 = vadd.s32 536870912, %v191_v1  ;;  %v295_v19 = vsel %vm281_vm1, %v292_v3, %v294_v15  ;;  %v322_v21 = vshrl.u32 %v291_v55, 16  ;;  %v321_v27 = vand.u32 65535, %v291_v55 }
  0xb3   :  { %v297_v22 = vand.u32 65535, %v1164_v16  ;;  %v298_v23 = vshrl.u32 %v1164_v16, 16  ;;  %v299_v25 = vand.u32 65535, %v295_v19  ;;  %v300_v26 = vshrl.u32 %v295_v19, 16 }
  0xb4   :  { %v193_v52 = vshrl.u32 %v192_v6, 30  ;;  %v284_v28 = vsel %vm280_vm13, %v264_v14, %v267_v39  ;;  %v286_v31 = vsel %vm282_vm0, %v270_v41, %v285_v17  ;;  %v1177_v36 = vshrl.u32 %v1104_v10, 5 }
  0xb5   :  { %v302_v32 = vmul.u32 %v300_v26, %v297_v22  ;;  %v303_v34 = vmul.u32 %v299_v25, %v298_v23  ;;  %v324_v42 = vmul.u32 %v322_v21, %v297_v22  ;;  %v1180_v45 = vsub.s32 32, %v1154_v4 }
  0xb6   :  { %v194_v38 = vshll.u32 %v193_v52, 30  ;;  %v1182_v49 = vadd.s32 1, %v796_v13  ;;  %v301_v51 = vmul.u32 %v299_v25, %v297_v22  ;;  %v1188_v39 = vsel %vm281_vm1, %v284_v28, %v286_v31 }
  0xb7   :  { %v305_v54 = vshll.u32 %v302_v32, 16  ;;  %v304_v41 = vmul.u32 %v300_v26, %v298_v23  ;;  %v325_v58 = vmul.u32 %v321_v27, %v298_v23  ;;  %v307_v10 = vshll.u32 %v303_v34, 16 }
  0xb8   :  { %v1184_v56 = vsub.s32 %v191_v1, %v194_v38  ;;  %v327_v60 = vshll.u32 %v324_v42, 16  ;;  %v403_v2 = vand.u32 2147483647, %v978_v37  ;;  %v306_v29 = vshrl.u32 %v302_v32, 16 }
  0xb9   :  { %vm309_vm3 = vc.u32 %v301_v51, %v305_v54  ;;  %v311_v59 = vadd.s32 %v305_v54, %v301_v51  ;;  %v323_v46 = vmul.u32 %v321_v27, %v297_v22  ;;  %v326_v3 = vmul.u32 %v322_v21, %v298_v23 }
  0xba   :  { %vm196_vm4 = vcmp.lt.s32.totalorder %v1184_v56, 0  ;;  %v197_v62 = vsub.s32 0, %v1184_v56  ;;  %v310_v0 = vsel %vm309_vm3, 1, %v865_v5  ;;  %v329_v1 = vshll.u32 %v325_v58, 16 }
  0xbb   :  { %v312_v48 = vadd.s32 %v310_v0, %v304_v41  ;;  %vm313_vm5 = vc.u32 %v311_v59, %v307_v10  ;;  %vm331_vm6 = vc.u32 %v323_v46, %v327_v60  ;;  %v333_v13 = vadd.s32 %v327_v60, %v323_v46 }
  0xbc   :  { %v198_v57 = vsel %vm196_vm4, %v197_v62, %v1184_v56  ;;  %v314_v43 = vsel %vm313_vm5, 1, %v865_v5  ;;  %vm569_vm7 = vcmp.gt.s32.totalorder %v1182_v49, 0  ;;  %v217_v14 = vsub.s32 4, %v193_v52 }
  0xbd   :  { %v199_v55 = vclz %v198_v57  ;;  %v316_v8 = vadd.s32 %v314_v43, %v312_v48  ;;  %v308_v15 = vshrl.u32 %v303_v34, 16  ;;  %v332_v6 = vsel %vm331_vm6, 1, %v865_v5 }
  0xbe   :  { %v334_v25 = vadd.s32 %v332_v6, %v326_v3  ;;  %vm335_vm8 = vc.u32 %v333_v13, %v329_v1  ;;  %v187_v22 = vadd.s32 %v1124_v30, %v1130_v50  ;;  %v341_v23 = vmul.u32 %v1164_v16, %v1188_v39 }
  0xbf   :  { %v788_v17 = vadd.s32 4294967294, %v199_v55  ;;  %v317_v19 = vadd.s32 %v316_v8, %v306_v29  ;;  %v336_v21 = vsel %vm335_vm8, 1, %v865_v5  ;;  %v410_v26 = vand.u32 8388607, %v403_v2 }
  0xc0   :  { %vm1208_vm9 = vcmp.le.f32.partialorder %v93_v20, 0.7853982  ;;  %v328_v31 = vshrl.u32 %v324_v42, 16  ;;  %v338_v32 = vadd.s32 %v336_v21, %v334_v25  ;;  %v218_v50 = vsel %vm95_vm2, %v217_v14, %v193_v52 }
  0xc1   :  { %vm789_vm10 = vcmp.lt.s32.totalorder %v788_v17, 0  ;;  %v1212_v28 = vadd.s32 %v317_v19, %v308_v15  ;;  %v330_v34 = vshrl.u32 %v325_v58, 16  ;;  %v1216_v16 = vadd.s32 %v333_v13, %v329_v1 }
  0xc2   :  { %v202_v30 = vsel %vm789_vm10, 0, %v788_v17  ;;  %v339_v54 = vadd.s32 %v338_v32, %v328_v31  ;;  %v421_v20 = vshrl.u32 %v860_v40, %v1180_v45  ;;  %v423_v42 = vshll.u32 %v860_v40, %v1154_v4 }
  0xc3   :  { %v203_v38 = vsub.s32 32, %v202_v30  ;;  %v207_v51 = vsub.s32 4294967266, %v202_v30  ;;  %v204_v39 = vshll.u32 %v1184_v56, %v202_v30  ;;  %vm343_vm11 = vc.u32 %v1212_v28, %v1216_v16 }
  0xc4   :  { %v424_v52 = vshrl.u32 %v861_v44, %v1180_v45  ;;  %v340_v10 = vadd.s32 %v339_v54, %v330_v34  ;;  %v426_v59 = vshll.u32 %v861_v44, %v1154_v4  ;;  %v427_v60 = vshrl.u32 %v862_v47, %v1180_v45 }
  0xc5   :  { %v205_v41 = vshrl.u32 %v187_v22, %v203_v38  ;;  %v208_v58 = vadd.s32 127, %v207_v51  ;;  %v429_v56 = vshll.u32 %v862_v47, %v1154_v4  ;;  %v430_v62 = vshrl.u32 %v863_v53, %v1180_v45 }
  0xc6   :  { %v432_v0 = vshll.u32 %v863_v53, %v1154_v4  ;;  %v344_v46 = vadd.s32 1, %v340_v10  ;;  %v433_v57 = vshrl.u32 %v864_v63, %v1180_v45  ;;  %v420_v43 = vshll.u32 %v859_v35, %v1154_v4 }
  0xc7   :  { %v206_v29 = vor.u32 %v205_v41, %v204_v39  ;;  %v209_v48 = vshll.u32 %v208_v58, 23  ;;  %v1241_v3 = vor.u32 %v424_v52, %v423_v42  ;;  %v428_v1 = vor.u32 %v427_v60, %v426_v59 }
  0xc8   :  { %v431_v55 = vor.u32 %v430_v62, %v429_v56  ;;  %v1246_v8 = vsel %vm569_vm7, %v1182_v49, 0  ;;  %v345_v14 = vsel %vm343_vm11, %v344_v46, %v340_v10  ;;  %v434_v15 = vor.u32 %v433_v57, %v432_v0 }
  0xc9   :  { %v210_v13 = vor.u32 4788187, %v209_v48  ;;  %v220_v6 = vsel %vm1208_vm9, 0, %v218_v50  ;;  %v346_v17 = vadd.s32 %v345_v14, %v341_v23  ;;  %v411_v4 = vor.u32 8388608, %v410_v26 }
  0xca   :  { %v422_v19 = vor.u32 %v421_v20, %v420_v43  ;;  %v213_v22 = vcvt.s32.f32 %v206_v29  ;;  %vm435_vm12 = vcmp.lt.s32.totalorder %v1177_v36, 1  ;;  %vm438_vm13 = vcmp.lt.s32.totalorder %v1177_v36, 4 }
  0xcb   :  { %v211_v25 = vand.u32 2147483647, %v210_v13  ;;  %v1256_v49 = vand.u32 31, %v1246_v8  ;;  %v347_v21 = vadd.s32 536870912, %v346_v17  ;;  %v444_v31 = vsel %vm438_vm13, %v431_v55, 920167782 }
  0xcc   :  { %v447_v32 = vsel %vm435_vm12, %v1241_v3, %v428_v1  ;;  %v237_v26 = vadd.s32 3, %v220_v6  ;;  %vm437_vm14 = vcmp.lt.s32.totalorder %v1177_v36, 3  ;;  %v448_v30 = vsel %vm438_vm13, %v434_v15, 1326507024 }
  0xcd   :  { %v214_v23 = vmul.f32 %v213_v22, %v211_v25  ;;  %v1266_v50 = vshrl.u32 %v347_v21, 30  ;;  %vm436_vm15 = vcmp.lt.s32.totalorder %v1177_v36, 2  ;;  %v449_v34 = vsel %vm437_vm14, %v431_v55, %v448_v30 }
  0xce   :  { %v1271_v38 = vshll.u32 %v411_v4, 8  ;;  %v443_v54 = vsel %vm435_vm12, %v422_v19, %v1241_v3  ;;  %v445_v20 = vsel %vm437_vm14, %v428_v1, %v444_v31  ;;  %v450_v39 = vsel %vm436_vm15, %v447_v32, %v449_v34 }
  0xcf   :  { %v215_v51 = vxor.u32 2147483648, %v214_v23  ;;  %v1281_v42 = vsub.s32 32, %v1256_v49  ;;  %v349_v52 = vshll.u32 %v1266_v50, 30  ;;  %v1286_v58 = vand.u32 3, %v237_v26 }
  0xd0   :  { %v452_v10 = vand.u32 65535, %v1271_v38  ;;  %v455_v59 = vshrl.u32 %v450_v39, 16  ;;  %v1298_v62 = vsel %vm436_vm15, %v443_v54, %v445_v20  ;;  %v454_v0 = vand.u32 65535, %v450_v39 }
  0xd1   :  { %v216_v41 = vsel %vm95_vm2, %v215_v51, %v214_v23  ;;  %v1294_v56 = vsub.s32 %v346_v17, %v349_v52  ;;  %v342_v48 = vadd.s32 %v1216_v16, %v1212_v28  ;;  %v419_v46 = vshrl.u32 %v859_v35, %v1180_v45 }
  0xd2   :  { %v1292_v60 = vsel %vm1208_vm9, %v936_v9, %v216_v41  ;;  %v457_v57 = vmul.u32 %v455_v59, %v452_v10  ;;  %v440_v43 = vsel %vm438_vm13, %v428_v1, 2102212464  ;;  %v453_v55 = vshrl.u32 %v1271_v38, 16 }
  0xd3   :  { %v221_v29 = vmul.f32 %v1292_v60, %v1292_v60  ;;  %vm351_vm0 = vcmp.lt.s32.totalorder %v1294_v56, 0  ;;  %v352_v27 = vsub.s32 0, %v1294_v56  ;;  %v476_v6 = vand.u32 65535, %v1298_v62 }
  0xd4   :  { %v460_v15 = vshll.u32 %v457_v57, 16  ;;  %v456_v16 = vmul.u32 %v454_v0, %v452_v10  ;;  %v458_v17 = vmul.u32 %v454_v0, %v453_v55  ;;  %v477_v45 = vshrl.u32 %v1298_v62, 16 }
  0xd5   :  { %v222_v13 = vmul.f32 -0.001358992, %v221_v29  ;;  %v229_v14 = vmul.f32 -0.00019511016, %v221_v29  ;;  %v353_v28 = vsel %vm351_vm0, %v352_v27, %v1294_v56  ;;  %v439_v21 = vsel %vm435_vm12, %v419_v46, %v422_v19 }
  0xd6   :  { %v354_v22 = vclz %v353_v28  ;;  %v372_v1 = vsub.s32 4, %v1266_v50  ;;  %v441_v31 = vsel %vm437_vm14, %v1241_v3, %v440_v43  ;;  %v459_v32 = vmul.u32 %v455_v59, %v453_v55 }
  0xd7   :  { %v223_v4 = vadd.f32 0.041655596, %v222_v13  ;;  %v230_v25 = vadd.f32 0.008332121, %v229_v14  ;;  %vm464_vm1 = vc.u32 %v456_v16, %v460_v15  ;;  %vm250_vm2 = vcmp.lt.s32.totalorder %v950_v18, 0 }
  0xd8   :  { %v791_v30 = vadd.s32 4294967294, %v354_v22  ;;  %v465_v34 = vsel %vm464_vm1, 1, %v865_v5  ;;  %v462_v51 = vshll.u32 %v458_v17, 16  ;;  %v466_v54 = vadd.s32 %v460_v15, %v456_v16 }
  0xd9   :  { %v224_v23 = vmul.f32 %v223_v4, %v221_v29  ;;  %v231_v26 = vmul.f32 %v230_v25, %v221_v29  ;;  %v478_v20 = vmul.u32 %v476_v6, %v452_v10  ;;  %v479_v39 = vmul.u32 %v477_v45, %v452_v10 }
  0xda   :  { %vm792_vm3 = vcmp.lt.s32.totalorder %v791_v30, 0  ;;  %v467_v41 = vadd.s32 %v465_v34, %v459_v32  ;;  %vm240_vm4 = vcmp.eq.s32.totalorder %v1286_v58, 0  ;;  %vm243_vm5 = vcmp.eq.s32.totalorder %v1286_v58, 2 }
  0xdb   :  { %v225_v19 = vadd.f32 -0.4999988, %v224_v23  ;;  %v232_v52 = vadd.f32 -0.16666654, %v231_v26  ;;  %v357_v3 = vsel %vm792_vm3, 0, %v791_v30  ;;  %vm468_vm6 = vc.u32 %v466_v54, %v462_v51 }
  0xdc   :  { %v480_v59 = vmul.u32 %v476_v6, %v453_v55  ;;  %v482_v62 = vshll.u32 %v479_v39, 16  ;;  %vm239_vm7 = vcmp.lt.s32.totalorder %v1286_v58, 2  ;;  %v358_v27 = vsub.s32 32, %v357_v3 }
  0xdd   :  { %v226_v0 = vmul.f32 %v225_v19, %v221_v29  ;;  %v233_v46 = vmul.f32 %v232_v52, %v221_v29  ;;  %v461_v43 = vshrl.u32 %v457_v57, 16  ;;  %vm236_vm8 = vweird.f32 %v936_v9 }
  0xde   :  { %vm1328_vm9 = vcmp.le.f32.partialorder %v248_v24, 0.7853982  ;;  %v359_v13 = vshll.u32 %v1294_v56, %v357_v3  ;;  %v362_v14 = vsub.s32 4294967266, %v357_v3  ;;  %v463_v15 = vshrl.u32 %v458_v17, 16 }
  0xdf   :  { %v469_v6 = vsel %vm468_vm6, 1, %v865_v5  ;;  %v227_v28 = vadd.f32 1.0, %v226_v0  ;;  %v234_v29 = vadd.f32 1.0, %v233_v46  ;;  %v360_v16 = vshrl.u32 %v342_v48, %v358_v27 }
  0xe0   :  { %v471_v4 = vadd.s32 %v469_v6, %v467_v41  ;;  %v363_v25 = vadd.s32 127, %v362_v14  ;;  %v484_v57 = vshll.u32 %v480_v59, 16  ;;  %vm486_vm10 = vc.u32 %v478_v20, %v482_v62 }
  0xe1   :  { %v488_v22 = vadd.s32 %v482_v62, %v478_v20  ;;  %v235_v32 = vmul.f32 %v234_v29, %v1292_v60  ;;  %v244_v24 = vxor.u32 2147483648, %v227_v28  ;;  %v481_v26 = vmul.u32 %v477_v45, %v453_v55 }
  0xe2   :  { %v472_v23 = vadd.s32 %v471_v4, %v461_v43  ;;  %v361_v30 = vor.u32 %v360_v16, %v359_v13  ;;  %v364_v34 = vshll.u32 %v363_v25, 23  ;;  %v487_v56 = vsel %vm486_vm10, 1, %v865_v5 }
  0xe3   :  { %vm490_vm11 = vc.u32 %v488_v22, %v484_v57  ;;  %v241_v17 = vxor.u32 2147483648, %v235_v32  ;;  %v373_v48 = vsel %vm250_vm2, %v372_v1, %v1266_v50  ;;  %v442_v51 = vsel %vm436_vm15, %v439_v21, %v441_v31 }
  0xe4   :  { %v483_v54 = vshrl.u32 %v479_v39, 16  ;;  %v365_v20 = vor.u32 4788187, %v364_v34  ;;  %v1341_v19 = vadd.s32 %v472_v23, %v463_v15  ;;  %v489_v60 = vadd.s32 %v487_v56, %v481_v26 }
  0xe5   :  { %v491_v55 = vsel %vm490_vm11, 1, %v865_v5  ;;  %v242_v45 = vsel %vm240_vm4, %v227_v28, %v241_v17  ;;  %v245_v52 = vsel %vm243_vm5, %v244_v24, %v235_v32  ;;  %v1348_v41 = vadd.s32 %v488_v22, %v484_v57 }
  0xe6   :  { %v558_v50 = vand.u32 2147483647, %v1029_v11  ;;  %v246_v36 = vsel %vm239_vm7, %v242_v45, %v245_v52  ;;  %v366_v21 = vand.u32 2147483647, %v365_v20  ;;  %v368_v1 = vcvt.s32.f32 %v361_v30 }
  0xe7   :  { %v493_v31 = vadd.s32 %v491_v55, %v489_v60  ;;  %v1354_v39 = vshrl.u32 %v1246_v8, 5  ;;  %v247_v3 = vsel %vm236_vm8, nan, %v246_v36  ;;  %v375_v62 = vsel %vm1328_vm9, 0, %v373_v48 }
  0xe8   :  { %v496_v0 = vmul.u32 %v1271_v38, %v442_v51  ;;  %753 = vmatmul.f32.vlgmr.msrb.gmra.mxu0 %v247_v3  ;;  %v369_v46 = vmul.f32 %v368_v1, %v366_v21  ;;  %v485_v27 = vshrl.u32 %v480_v59, 16  ;;  %vm498_vm12 = vc.u32 %v1341_v19, %v1348_v41 }
  0xe9   :  { %v494_v43 = vadd.s32 %v493_v31, %v483_v54  ;;  %v565_v58 = vand.u32 8388607, %v558_v50  ;;  %v576_v8 = vshrl.u32 %v860_v40, %v1281_v42  ;;  %v579_v9 = vshrl.u32 %v861_v44, %v1281_v42 }
  0xea   :  { %v582_v13 = vshrl.u32 %v862_v47, %v1281_v42  ;;  %v370_v38 = vxor.u32 2147483648, %v369_v46  ;;  %v584_v59 = vshll.u32 %v862_v47, %v1256_v49  ;;  %v585_v15 = vshrl.u32 %v863_v53, %v1281_v42 }
  0xeb   :  { %v495_v14 = vadd.s32 %v494_v43, %v485_v27  ;;  %v575_v6 = vshll.u32 %v859_v35, %v1256_v49  ;;  %v578_v28 = vshll.u32 %v860_v40, %v1256_v49  ;;  %v581_v29 = vshll.u32 %v861_v44, %v1256_v49 }
  0xec   :  { %v588_v16 = vshrl.u32 %v864_v63, %v1281_v42  ;;  %v371_v4 = vsel %vm250_vm2, %v370_v38, %v369_v46  ;;  %v586_v47 = vor.u32 %v585_v15, %v584_v59  ;;  %v587_v57 = vshll.u32 %v863_v53, %v1256_v49 }
  0xed   :  { %v499_v25 = vadd.s32 1, %v495_v14  ;;  %v374_v22 = vsel %vm1328_vm9, %v950_v18, %v371_v4  ;;  %v1390_v32 = vor.u32 %v576_v8, %v575_v6  ;;  %v1392_v40 = vor.u32 %v579_v9, %v578_v28 }
  0xee   :  { %v1394_v44 = vor.u32 %v582_v13, %v581_v29  ;;  %v376_v24 = vmul.f32 %v374_v22, %v374_v22  ;;  %v589_v23 = vor.u32 %v588_v16, %v587_v57  ;;  %vm593_vm13 = vcmp.lt.s32.totalorder %v1354_v39, 4 }
  0xef   :  { %v500_v63 = vsel %vm498_vm12, %v499_v25, %v495_v14  ;;  %v392_v26 = vadd.s32 3, %v375_v62  ;;  %v566_v49 = vor.u32 8388608, %v565_v58  ;;  %v599_v10 = vsel %vm593_vm13, %v586_v47, 920167782 }
  0xf0   :  { %v501_v53 = vadd.s32 %v500_v63, %v496_v0  ;;  %v377_v30 = vmul.f32 -0.001358992, %v376_v24  ;;  %v384_v34 = vmul.f32 -0.00019511016, %v376_v24  ;;  %vm590_vm14 = vcmp.lt.s32.totalorder %v1354_v39, 1 }
  0xf1   :  { %vm592_vm15 = vcmp.lt.s32.totalorder %v1354_v39, 3  ;;  %v598_v17 = vsel %vm590_vm14, %v1390_v32, %v1392_v40  ;;  %v602_v51 = vsel %vm590_vm14, %v1392_v40, %v1394_v44  ;;  %v603_v60 = vsel %vm593_vm13, %v589_v23, 1326507024 }
  0xf2   :  { %v502_v56 = vadd.s32 536870912, %v501_v53  ;;  %v600_v48 = vsel %vm592_vm15, %v1394_v44, %v599_v10  ;;  %v378_v54 = vadd.f32 0.041655596, %v377_v30  ;;  %v385_v20 = vadd.f32 0.008332121, %v384_v34 }
  0xf3   :  { %vm591_vm0 = vcmp.lt.s32.totalorder %v1354_v39, 2  ;;  %v604_v45 = vsel %vm592_vm15, %v586_v47, %v603_v60  ;;  %v1422_v52 = vshll.u32 %v566_v49, 8  ;;  %v393_v46 = vand.u32 3, %v392_v26 }
  0xf4   :  { %v1417_v55 = vshrl.u32 %v502_v56, 30  ;;  %v379_v36 = vmul.f32 %v378_v54, %v376_v24  ;;  %v386_v21 = vmul.f32 %v385_v20, %v376_v24  ;;  %v601_v1 = vsel %vm591_vm0, %v598_v17, %v600_v48 }
  0xf5   :  { %v605_v31 = vsel %vm591_vm0, %v602_v51, %v604_v45  ;;  %v607_v58 = vand.u32 65535, %v1422_v52  ;;  %v632_v9 = vshrl.u32 %v601_v1, 16  ;;  %v631_v14 = vand.u32 65535, %v601_v1 }
  0xf6   :  { %v504_v3 = vshll.u32 %v1417_v55, 30  ;;  %v380_v62 = vadd.f32 -0.4999988, %v379_v36  ;;  %v387_v0 = vadd.f32 -0.16666654, %v386_v21  ;;  %v610_v27 = vshrl.u32 %v605_v31, 16 }
  0xf7   :  { %v609_v8 = vand.u32 65535, %v605_v31  ;;  %v608_v15 = vshrl.u32 %v1422_v52, 16  ;;  %vm391_vm2 = vweird.f32 %v950_v18  ;;  %vm394_vm3 = vcmp.lt.s32.totalorder %v393_v46, 2 }
  0xf8   :  { %v505_v43 = vsub.s32 %v501_v53, %v504_v3  ;;  %v381_v13 = vmul.f32 %v380_v62, %v376_v24  ;;  %v388_v38 = vmul.f32 %v387_v0, %v376_v24  ;;  %v612_v6 = vmul.u32 %v610_v27, %v607_v58 }
  0xf9   :  { %v613_v4 = vmul.u32 %v609_v8, %v608_v15  ;;  %v634_v47 = vmul.u32 %v632_v9, %v607_v58  ;;  %v611_v26 = vmul.u32 %v609_v8, %v607_v58  ;;  %vm395_vm4 = vcmp.eq.s32.totalorder %v393_v46, 0 }
  0xfa   :  { %vm506_vm1 = vcmp.lt.s32.totalorder %v505_v43, 0  ;;  %v507_v59 = vsub.s32 0, %v505_v43  ;;  %v382_v28 = vadd.f32 1.0, %v381_v13  ;;  %v389_v29 = vadd.f32 1.0, %v388_v38 }
  0xfb   :  { %v615_v25 = vshll.u32 %v612_v6, 16  ;;  %vm398_vm5 = vcmp.eq.s32.totalorder %v393_v46, 2  ;;  %v497_v24 = vadd.s32 %v1348_v41, %v1341_v19  ;;  %v633_v53 = vmul.u32 %v631_v14, %v607_v58 }
  0xfc   :  { %v508_v16 = vsel %vm506_vm1, %v507_v59, %v505_v43  ;;  %v390_v57 = vmul.f32 %v389_v29, %v374_v22  ;;  %v399_v63 = vxor.u32 2147483648, %v382_v28  ;;  %v614_v30 = vmul.u32 %v610_v27, %v608_v15 }
  0xfd   :  { %v509_v23 = vclz %v508_v16  ;;  %vm619_vm6 = vc.u32 %v611_v26, %v615_v25  ;;  %v617_v56 = vshll.u32 %v613_v4, 16  ;;  %v621_v48 = vadd.s32 %v615_v25, %v611_v26 }
  0xfe   :  { %v396_v49 = vxor.u32 2147483648, %v390_v57  ;;  %v400_v34 = vsel %vm398_vm5, %v399_v63, %v390_v57  ;;  %v620_v17 = vsel %vm619_vm6, 1, %v865_v5  ;;  %v637_v54 = vshll.u32 %v634_v47, 16 }
  0xff   :  { %v794_v10 = vadd.s32 4294967294, %v509_v23  ;;  %v622_v22 = vadd.s32 %v620_v17, %v614_v30  ;;  %vm623_vm8 = vc.u32 %v621_v48, %v617_v56  ;;  %v635_v45 = vmul.u32 %v631_v14, %v608_v15 }
 0x100   :  { %v397_v51 = vsel %vm395_vm4, %v382_v28, %v396_v49  ;;  %v616_v21 = vshrl.u32 %v612_v6, 16  ;;  %v624_v31 = vsel %vm623_vm8, 1, %v865_v5  ;;  %v636_v3 = vmul.u32 %v632_v9, %v608_v15 }
 0x101   :  { %vm795_vm7 = vcmp.lt.s32.totalorder %v794_v10, 0  ;;  %v401_v20 = vsel %vm394_vm3, %v397_v51, %v400_v34  ;;  %vm641_vm9 = vc.u32 %v633_v53, %v637_v54  ;;  %v626_v27 = vadd.s32 %v624_v31, %v622_v22 }
 0x102   :  { %v512_v60 = vsel %vm795_vm7, 0, %v794_v10  ;;  %v402_v19 = vsel %vm391_vm2, nan, %v401_v20  ;;  %v642_v46 = vsel %vm641_vm9, 1, %v865_v5  ;;  %v639_v58 = vshll.u32 %v635_v45, 16 }
 0x103   :  { %v513_v41 = vsub.s32 32, %v512_v60  ;;  %v517_v36 = vsub.s32 4294967266, %v512_v60  ;;  %756 = vmatmul.f32.vlgmr.msra.gmra.mxu1 %v402_v19  ;;  %v514_v1 = vshll.u32 %v505_v43, %v512_v60  ;;  %v643_v8 = vadd.s32 %v637_v54, %v633_v53 }
 0x104   :  { %v644_v13 = vadd.s32 %v642_v46, %v636_v3  ;;  %v627_v14 = vadd.s32 %v626_v27, %v616_v21  ;;  %v574_v59 = vshrl.u32 %v859_v35, %v1281_v42  ;;  %v595_v43 = vsel %vm593_vm13, %v1394_v44, 2102212464 }
 0x105   :  { %v515_v62 = vshrl.u32 %v497_v24, %v513_v41  ;;  %v518_v0 = vadd.s32 127, %v517_v36  ;;  %vm645_vm10 = vc.u32 %v643_v8, %v639_v58  ;;  %v618_v15 = vshrl.u32 %v613_v4, 16 }
 0x106   :  { %v646_v6 = vsel %vm645_vm10, 1, %v865_v5  ;;  %v594_v28 = vsel %vm590_vm14, %v574_v59, %v1390_v32  ;;  %v638_v29 = vshrl.u32 %v634_v47, 16  ;;  %v596_v35 = vsel %vm592_vm15, %v1392_v40, %v595_v43 }
 0x107   :  { %v516_v38 = vor.u32 %v515_v62, %v514_v1  ;;  %v519_v18 = vshll.u32 %v518_v0, 23  ;;  %v648_v16 = vadd.s32 %v646_v6, %v644_v13  ;;  %v628_v42 = vadd.s32 %v627_v14, %v618_v15 }
 0x108   :  { %v640_v63 = vshrl.u32 %v635_v45, 16  ;;  %v647_v26 = vadd.s32 %v643_v8, %v639_v58  ;;  %v597_v5 = vsel %vm591_vm0, %v594_v28, %v596_v35  ;;  %vm405_vm12 = vcmp.lt.s32.totalorder %v978_v37, 0 }
 0x109   :  { %v520_v9 = vor.u32 4788187, %v519_v18  ;;  %v523_v57 = vcvt.s32.f32 %v516_v38  ;;  %v649_v44 = vadd.s32 %v648_v16, %v638_v29  ;;  %vm1457_vm13 = vcmp.le.f32.partialorder %v403_v2, 0.7853982 }
 0x10a   :  { %vm653_vm11 = vc.u32 %v628_v42, %v647_v26  ;;  %v651_v53 = vmul.u32 %v1422_v52, %v597_v5  ;;  %v527_v49 = vsub.s32 4, %v1417_v55  ;;  %vm546_vm15 = vweird.f32 %v978_v37 }
 0x10b   :  { %v521_v25 = vand.u32 2147483647, %v520_v9  ;;  %v650_v4 = vadd.s32 %v649_v44, %v640_v63  ;;  %v652_v9 = vadd.s32 %v647_v26, %v628_v42  ;;  %vm560_vm4 = vcmp.lt.s32.totalorder %v1029_v11, 0 }
 0x10c   :  { %v528_v2 = vsel %vm405_vm12, %v527_v49, %v1417_v55  ;;  %vm559_vm5 = vcmp.le.f32.partialorder %v558_v50, 0.7853982  ;;  %vm701_vm9 = vweird.f32 %v1029_v11 }
 0x10d   :  { %v524_v23 = vmul.f32 %v523_v57, %v521_v25  ;;  %v654_v32 = vadd.s32 1, %v650_v4  ;;  %v530_v52 = vsel %vm1457_vm13, 0, %v528_v2 }
 0x10e   :  { %v547_v21 = vadd.s32 3, %v530_v52 }
 0x10f   :  { %v525_v24 = vxor.u32 2147483648, %v524_v23  ;;  %v655_v10 = vsel %vm653_vm11, %v654_v32, %v650_v4 }
 0x110   :  { %v656_v34 = vadd.s32 %v655_v10, %v651_v53  ;;  %v548_v27 = vand.u32 3, %v547_v21 }
 0x111   :  { %v526_v40 = vsel %vm405_vm12, %v525_v24, %v524_v23 }
 0x112   :  { %v529_v39 = vsel %vm1457_vm13, %v978_v37, %v526_v40  ;;  %v657_v48 = vadd.s32 536870912, %v656_v34  ;;  %vm550_vm0 = vcmp.eq.s32.totalorder %v548_v27, 0  ;;  %vm553_vm1 = vcmp.eq.s32.totalorder %v548_v27, 2 }
 0x113   :  { %v531_v30 = vmul.f32 %v529_v39, %v529_v39  ;;  %vm549_vm3 = vcmp.lt.s32.totalorder %v548_v27, 2 }
 0x114   :  { %v658_v54 = vshrl.u32 %v657_v48, 30 }
 0x115   :  { %v532_v56 = vmul.f32 -0.001358992, %v531_v30  ;;  %v539_v17 = vmul.f32 -0.00019511016, %v531_v30 }
 0x116   :  { %v659_v45 = vshll.u32 %v658_v54, 30  ;;  %v682_v26 = vsub.s32 4, %v658_v54 }
 0x117   :  { %v533_v51 = vadd.f32 0.041655596, %v532_v56  ;;  %v540_v22 = vadd.f32 0.008332121, %v539_v17 }
 0x118   :  { %v660_v36 = vsub.s32 %v656_v34, %v659_v45  ;;  %v683_v40 = vsel %vm560_vm4, %v682_v26, %v658_v54 }
 0x119   :  { %v534_v20 = vmul.f32 %v533_v51, %v531_v30  ;;  %v541_v60 = vmul.f32 %v540_v22, %v531_v30 }
 0x11a   :  { %vm661_vm14 = vcmp.lt.s32.totalorder %v660_v36, 0  ;;  %v662_v3 = vsub.s32 0, %v660_v36 }
 0x11b   :  { %v535_v19 = vadd.f32 -0.4999988, %v534_v20  ;;  %v542_v41 = vadd.f32 -0.16666654, %v541_v60 }
 0x11c   :  { %v663_v55 = vsel %vm661_vm14, %v662_v3, %v660_v36 }
 0x11d   :  { %v536_v1 = vmul.f32 %v535_v19, %v531_v30  ;;  %v543_v31 = vmul.f32 %v542_v41, %v531_v30  ;;  %v664_v46 = vclz %v663_v55 }
 0x11f   :  { %v537_v62 = vadd.f32 1.0, %v536_v1  ;;  %v544_v0 = vadd.f32 1.0, %v543_v31  ;;  %v797_v13 = vadd.s32 4294967294, %v664_v46  ;;  %v857_v1 = vld [vmem:[%s1503_s5] ss:$0 sm:$0xff] }
 0x121   :  { %v545_v58 = vmul.f32 %v544_v0, %v529_v39  ;;  %v554_v8 = vxor.u32 2147483648, %v537_v62  ;;  %vm798_vm2 = vcmp.lt.s32.totalorder %v797_v13, 0  ;;  %v685_v39 = vsel %vm559_vm5, 0, %v683_v40 }
 0x122   :  { %v667_v59 = vsel %vm798_vm2, 0, %v797_v13  ;;  %v702_v17 = vadd.s32 3, %v685_v39 }
 0x123   :  { %v551_v38 = vxor.u32 2147483648, %v545_v58  ;;  %v555_v14 = vsel %vm553_vm1, %v554_v8, %v545_v58  ;;  %v668_v15 = vsub.s32 32, %v667_v59  ;;  %v672_v6 = vsub.s32 4294967266, %v667_v59 }
 0x124   :  { %v669_v29 = vshll.u32 %v660_v36, %v667_v59  ;;  %v703_v22 = vand.u32 3, %v702_v17  ;;  %v858_v36 = vld [vmem:[%s1501_s4] ss:$0 sm:$0xff] }
 0x125   :  { %v552_v18 = vsel %vm550_vm0, %v537_v62, %v551_v38  ;;  %v670_v16 = vshrl.u32 %v652_v9, %v668_v15  ;;  %v673_v25 = vadd.s32 127, %v672_v6  ;;  %v733_v21 = vmul.f32 %v858_v36, %v931_v7 }
 0x126   :  { %v556_v43 = vsel %vm549_vm3, %v552_v18, %v555_v14  ;;  %vm705_vm6 = vcmp.eq.s32.totalorder %v703_v22, 0  ;;  %vm708_vm7 = vcmp.eq.s32.totalorder %v703_v22, 2  ;;  %vm704_vm8 = vcmp.lt.s32.totalorder %v703_v22, 2 }
 0x127   :  { %v557_v28 = vsel %vm546_vm15, nan, %v556_v43  ;;  %v671_v57 = vor.u32 %v670_v16, %v669_v29  ;;  %v674_v35 = vshll.u32 %v673_v25, 23  ;;  %v736_v8 = vmul.f32 %v858_v36, %v1007_v61 }
 0x128   :  { %759 = vmatmul.f32.vlgmr.msra.gmra.mxu2 %v557_v28 }
 0x129   :  { %v675_v63 = vor.u32 4788187, %v674_v35  ;;  %v678_v44 = vcvt.s32.f32 %v671_v57 }
 0x12b   :  { %v676_v37 = vand.u32 2147483647, %v675_v63 }
 0x12d   :  { %v679_v23 = vmul.f32 %v678_v44, %v676_v37 }
 0x12f   :  { %v680_v5 = vxor.u32 2147483648, %v679_v23 }
 0x131   :  { %v681_v42 = vsel %vm560_vm4, %v680_v5, %v679_v23 }
 0x132   :  { %v684_v4 = vsel %vm559_vm5, %v1029_v11, %v681_v42  ;;  %v734_v11 = vmul.f32 %v858_v36, %v939_v12 }
 0x133   :  { %v686_v24 = vmul.f32 %v684_v4, %v684_v4 }
 0x135   :  { %v687_v32 = vmul.f32 -0.001358992, %v686_v24  ;;  %v694_v47 = vmul.f32 -0.00019511016, %v686_v24 }
 0x137   :  { %v688_v53 = vadd.f32 0.041655596, %v687_v32  ;;  %v695_v49 = vadd.f32 0.008332121, %v694_v47 }
 0x139   :  { %v689_v10 = vmul.f32 %v688_v53, %v686_v24  ;;  %v696_v30 = vmul.f32 %v695_v49, %v686_v24 }
 0x13b   :  { %v690_v34 = vadd.f32 -0.4999988, %v689_v10  ;;  %v697_v56 = vadd.f32 -0.16666654, %v696_v30 }
 0x13d   :  { %v691_v48 = vmul.f32 %v690_v34, %v686_v24  ;;  %v698_v2 = vmul.f32 %v697_v56, %v686_v24 }
 0x13f   :  { %v692_v51 = vadd.f32 1.0, %v691_v48  ;;  %v699_v50 = vadd.f32 1.0, %v698_v2 }
 0x141   :  { %v700_v52 = vmul.f32 %v699_v50, %v684_v4  ;;  %v709_v20 = vxor.u32 2147483648, %v692_v51 }
 0x143   :  { %v706_v60 = vxor.u32 2147483648, %v700_v52  ;;  %v710_v45 = vsel %vm708_vm7, %v709_v20, %v700_v52 }
 0x145   :  { %v707_v54 = vsel %vm705_vm6, %v692_v51, %v706_v60 }
 0x146   :  { %v711_v19 = vsel %vm704_vm8, %v707_v54, %v710_v45 }
 0x147   :  { %v712_v41 = vsel %vm701_vm9, nan, %v711_v19 }
 0x148   :  { %762 = vmatmul.f32.vlgmr.msra.gmra.mxu3 %v712_v41 }
 0x165   :  { %v754_v31 = vpop.f32.mrf.mxu0 }
 0x166   :  { %v755_v3 = vadd.f32 %v754_v31, %v733_v21 }
 0x168   :  { %v770_v62 = vadd.f32 %v857_v1, %v755_v3 }
 0x16a   :  { %774 = vst [vmem:[%s1504_s7] sm:$0xff] %v770_v62 }
 0x180   :  { %v757_v0 = vpop.f32.mrf.mxu1 }
 0x181   :  { %v758_v55 = vadd.f32 %v757_v0, %v734_v11 }
 0x183   :  { %v771_v27 = vadd.f32 %v857_v1, %v758_v55 }
 0x185   :  { %775 = vst [vmem:[%s1504_s7 + $0x8] sm:$0xff] %v771_v27 }
 0x1ab   :  { %v760_v7 = vpop.f32.mrf.mxu2 }
 0x1ac   :  { %v761_v46 = vadd.f32 %v760_v7, %v971_v33 }
 0x1ae   :  { %v772_v58 = vadd.f32 %v857_v1, %v761_v46 }
 0x1b0   :  { %776 = vst [vmem:[%s1504_s7 + $0x10] sm:$0xff] %v772_v58 }
 0x1cb   :  { %v763_v13 = vpop.f32.mrf.mxu3 }
 0x1cc   :  { %v764_v38 = vadd.f32 %v763_v13, %v736_v8 }
 0x1ce   :  { %v773_v12 = vadd.f32 %v857_v1, %v764_v38 }
 0x1d0   :  { %777 = vst [vmem:[%s1504_s7 + $0x18] sm:$0xff] %v773_v12 }

</bundles_post_ra>
